<compile_context>
chip_gen: v7x
topology: tpu7x:2x2x1
jax: 0.10.0
libtpu: 0.0.40
codegen_flags: <defaults>
</compile_context>

<pallas_src>
import functools

import jax
import jax.numpy as jnp
from jax.experimental import pallas as pl
from jax.experimental.pallas import tpu as pltpu

NEG_SLOPE = 0.01   # nn.LeakyReLU default
BN_EPS = 1e-5      # nn.BatchNorm2d default


def _round_up(x, m):
    return ((x + m - 1) // m) * m


def _cdiv(a, b):
    return -(-a // b)


def _vmem_limit_bytes():
    """Scoped-VMEM limit with headroom, per chip generation."""
    try:
        cap = int(pltpu.get_tpu_info().vmem_capacity_bytes)
    except Exception:
        cap = 64 << 20          # conservative: smallest physical VMEM (v7x)
    # ~16 MiB headroom for compiler internals; never ask for more than 96 MiB.
    return int(max(16 << 20, min(cap - (16 << 20), 96 << 20)))


def _spp_kernel(x_ref, w_ref, p_ref, o_ref, acc_ref, *,
                inv_hw, hw_true, thw, hw_ragged):
    """One (batch-tile, HW-tile) grid step.

    x_ref:   (TN, C_in, THW)   input spatial tile (last tile may run past H*W)
    w_ref:   (C_in, C_out)     1x1-conv weight, pre-transposed, f32
    p_ref:   (3, C_out)        rows = [conv bias, bn scale, bn shift], f32
    o_ref:   (1, TN, C_out)    tiny pooled/conv/BN result (resident across HW axis)
    acc_ref: (TN, C_in) f32    partial spatial-sum accumulator (scratch)
    """
    j = pl.program_id(1)

    @pl.when(j == 0)
    def _():
        acc_ref[...] = jnp.zeros_like(acc_ref)

    xv = x_ref[...].astype(jnp.float32)
    if hw_ragged:
        # Ragged tail handled in-kernel: zero lanes beyond the true H*W so the
        # wrapper never pads the input (no extra HBM read+write pass).
        lane = jax.lax.broadcasted_iota(jnp.int32, xv.shape, dimension=2)
        xv = jnp.where(lane < (hw_true - j * thw), xv, 0.0)
    acc_ref[...] += jnp.sum(xv, axis=-1)

    @pl.when(j == pl.num_programs(1) - 1)
    def _():
        # AdaptiveAvgPool2d(1): divide by the TRUE H*W (masked lanes summed 0).
        pooled = acc_ref[...] * inv_hw                                   # (TN, C_in)
        # 1x1 conv == matmul (MXU) + bias.
        y = jnp.dot(pooled, w_ref[...], preferred_element_type=jnp.float32)
        y = y + p_ref[0:1, :]                                            # conv bias
        # LeakyReLU(0.01).
        y = jnp.where(y >= 0, y, NEG_SLOPE * y)
        # Folded eval-mode BatchNorm: y * scale + shift.
        y = y * p_ref[1:2, :] + p_ref[2:3, :]
        o_ref[...] = y[None, :, :].astype(o_ref.dtype)


def sp_pooling_forward(x, conv_w, conv_b, bn_gamma, bn_beta, bn_mean, bn_var):
    """x: (N, C_in, H, W) NCHW.  conv_w: (C_out, C_in, 1, 1).  Returns (N, C_out, H, W)."""
    N, C_in, H, W = x.shape
    C_out = conv_w.shape[0]
    HW = H * W
    itemsize = jnp.dtype(x.dtype).itemsize

    # ---- tile selection (VMEM-accurate, per-generation limit) ---------------
    vmem_limit = _vmem_limit_bytes()
    in_budget = vmem_limit // 2                       # double-buffered input tiles
    bytes_per_lane = max(C_in * itemsize, 1)          # per batch element per lane

    hw_full = _round_up(HW, 128)
    # ~2 MiB per input buffer (per batch element), lane-dense, never above full HW.
    thw = min(hw_full, max(128, ((2 << 20) // bytes_per_lane) // 128 * 128))
    # Shrink if even tn=1 would not fit the budget (very large C_in, e.g. v5e).
    max_thw_fit = max(128, (in_budget // (2 * bytes_per_lane)) // 128 * 128)
    thw = min(thw, max_thw_fit)

    tn = in_budget // (2 * bytes_per_lane * thw)
    tn = int(max(1, min(tn, N, 64)))
    # Keep >= 2 batch grid steps when N > 1 (megacore sharding on v7x).
    if N > 1 and _cdiv(N, tn) < 2:
        tn = _cdiv(N, 2)
    n_tiles = _cdiv(N, tn)
    hw_tiles = _cdiv(HW, thw)

    # ---- parameter prep: fold BN, stack per-channel vectors into (3, C_out) --
    w_t = conv_w.reshape(C_out, C_in).T.astype(jnp.float32)            # (C_in, C_out)
    bn_scale = bn_gamma.astype(jnp.float32) * jax.lax.rsqrt(
        bn_var.astype(jnp.float32) + BN_EPS)
    bn_shift = bn_beta.astype(jnp.float32) - bn_mean.astype(jnp.float32) * bn_scale
    params = jnp.stack(
        [conv_b.astype(jnp.float32), bn_scale, bn_shift], axis=0)      # (3, C_out)

    # NCHW -> (N, C_in, HW); free layout reshape, no padding copy.
    x_flat = x.reshape(N, C_in, HW)

    kernel = functools.partial(
        _spp_kernel,
        inv_hw=1.0 / float(HW),
        hw_true=HW,
        thw=thw,
        hw_ragged=(HW % thw != 0),
    )

    y = pl.pallas_call(
        kernel,
        out_shape=jax.ShapeDtypeStruct((n_tiles, tn, C_out), x.dtype),
        grid_spec=pltpu.PrefetchScalarGridSpec(
            num_scalar_prefetch=0,
            grid=(n_tiles, hw_tiles),
            in_specs=[
                pl.BlockSpec((tn, C_in, thw), lambda n, j: (n, 0, j)),
                pl.BlockSpec((C_in, C_out), lambda n, j: (0, 0)),
                pl.BlockSpec((3, C_out), lambda n, j: (0, 0)),
            ],
            out_specs=pl.BlockSpec((1, tn, C_out), lambda n, j: (n, 0, 0)),
            scratch_shapes=[pltpu.VMEM((tn, C_in), jnp.float32)],
        ),
        compiler_params=pltpu.CompilerParams(
            dimension_semantics=("parallel", "arbitrary"),
            vmem_limit_bytes=int(vmem_limit)),
    )(x_flat, w_t, params)

    y = y.reshape(n_tiles * tn, C_out)[:N]            # tiny (N, C_out); ~free
    # Bilinear resize of a 1x1 image back to (H, W) is an exact broadcast; leave
    # it to XLA so it can fuse into consumers instead of a kernel writeback.
    return jnp.broadcast_to(y[:, :, None, None], (N, C_out, H, W))


def _reference(x, conv_w, conv_b, bn_gamma, bn_beta, bn_mean, bn_var):
    # Pure-JAX reference of the same forward semantics (eval-mode BN).
    pooled = jnp.mean(x.astype(jnp.float32), axis=(2, 3))              # (N, C_in)
    y = pooled @ conv_w.reshape(conv_w.shape[0], -1).T + conv_b
    y = jnp.where(y >= 0, y, NEG_SLOPE * y)
    y = (y - bn_mean) * jax.lax.rsqrt(bn_var + BN_EPS) * bn_gamma + bn_beta
    N, C_out = y.shape
    H, W = x.shape[-2:]
    return jnp.broadcast_to(y[:, :, None, None], (N, C_out, H, W)).astype(x.dtype)


if __name__ == "__main__":
    key = jax.random.PRNGKey(0)
    N, C_in, H, W = 2, 4, 16, 16
    C_out = 8

    k = jax.random.split(key, 7)
    x = jax.random.normal(k[0], (N, C_in, H, W), dtype=jnp.float32)
    conv_w = 0.1 * jax.random.normal(k[1], (C_out, C_in, 1, 1), dtype=jnp.float32)
    conv_b = 0.1 * jax.random.normal(k[2], (C_out,), dtype=jnp.float32)
    bn_gamma = 1.0 + 0.05 * jax.random.normal(k[3], (C_out,), dtype=jnp.float32)
    bn_beta = 0.05 * jax.random.normal(k[4], (C_out,), dtype=jnp.float32)
    bn_mean = 0.05 * jax.random.normal(k[5], (C_out,), dtype=jnp.float32)
    bn_var = jnp.abs(1.0 + 0.05 * jax.random.normal(k[6], (C_out,), dtype=jnp.float32))

    out = sp_pooling_forward(x, conv_w, conv_b, bn_gamma, bn_beta, bn_mean, bn_var)
    out = jax.block_until_ready(out)

    ref = _reference(x, conv_w, conv_b, bn_gamma, bn_beta, bn_mean, bn_var)
    assert out.shape == (N, C_out, H, W)
    assert jnp.allclose(out, ref, atol=1e-5, rtol=1e-5)
    print("KERNEL_OK")
</pallas_src>

<mosaic_0001>
module attributes {stable_mosaic.version = 11 : i64} {
  func.func @_spp_kernel(%arg0: i32, %arg1: i32, %arg2: memref<1x4x256xf32, #tpu.memory_space<vmem>>, %arg3: memref<4x8xf32, #tpu.memory_space<vmem>>, %arg4: memref<3x8xf32, #tpu.memory_space<vmem>>, %arg5: memref<1x1x8xf32, #tpu.memory_space<vmem>>, %arg6: memref<1x4xf32, #tpu.memory_space<vmem>>) attributes {dimension_semantics = [#tpu.dimension_semantics<parallel>, #tpu.dimension_semantics<arbitrary>], iteration_bounds = array<i64: 2, 1>, scalar_prefetch = 0 : i64, scratch_operands = 1 : i64, tpu.core_type = #tpu.core_type<tc>, window_params = [{transform_indices = @transform_0, window_bounds = array<i64: 1, 4, 256>}, {pipeline_mode = #tpu.pipeline_mode<synchronous>, transform_indices = @transform_1, window_bounds = array<i64: 4, 8>}, {pipeline_mode = #tpu.pipeline_mode<synchronous>, transform_indices = @transform_2, window_bounds = array<i64: 3, 8>}, {transform_indices = @transform_3, window_bounds = array<i64: 1, 1, 8>}]} {
    %c0_i32 = arith.constant 0 : i32
    %0 = arith.cmpi eq, %arg1, %c0_i32 : i32
    %1 = arith.extui %0 : i1 to i32
    %c0_i32_0 = arith.constant 0 : i32
    %2 = arith.cmpi ne, %1, %c0_i32_0 : i32
    scf.if %2 {
      %cst_9 = arith.constant 0.000000e+00 : f32
      %11 = vector.broadcast %cst_9 : f32 to vector<1x4xf32>
      %c0_10 = arith.constant 0 : index
      %c0_11 = arith.constant 0 : index
      %12 = vector.load %arg6[%c0_10, %c0_11] : memref<1x4xf32, #tpu.memory_space<vmem>>, vector<1x4xf32>
      tpu.vector_store %arg6[%c0_10, %c0_11], %11 {strides = array<i32>} : memref<1x4xf32, #tpu.memory_space<vmem>>, vector<1x4xf32>,
    } else {
    }
    %c0 = arith.constant 0 : index
    %c0_1 = arith.constant 0 : index
    %c0_2 = arith.constant 0 : index
    %3 = vector.load %arg2[%c0, %c0_1, %c0_2] : memref<1x4x256xf32, #tpu.memory_space<vmem>>, vector<1x4x256xf32>
    %c0_3 = arith.constant 0 : index
    %c0_4 = arith.constant 0 : index
    %4 = vector.load %arg6[%c0_3, %c0_4] : memref<1x4xf32, #tpu.memory_space<vmem>>, vector<1x4xf32>
    %cst = arith.constant dense<0.000000e+00> : vector<1x4xf32>
    %5 = vector.multi_reduction <add>, %3, %cst [2] : vector<1x4x256xf32> to vector<1x4xf32>
    %6 = arith.addf %4, %5 : vector<1x4xf32>
    %c0_5 = arith.constant 0 : index
    %c0_6 = arith.constant 0 : index
    %7 = vector.load %arg6[%c0_5, %c0_6] : memref<1x4xf32, #tpu.memory_space<vmem>>, vector<1x4xf32>
    tpu.vector_store %arg6[%c0_5, %c0_6], %6 {strides = array<i32>} : memref<1x4xf32, #tpu.memory_space<vmem>>, vector<1x4xf32>,
    %c0_i32_7 = arith.constant 0 : i32
    %8 = arith.cmpi eq, %arg1, %c0_i32_7 : i32
    %9 = arith.extui %8 : i1 to i32
    %c0_i32_8 = arith.constant 0 : i32
    %10 = arith.cmpi ne, %9, %c0_i32_8 : i32
    scf.if %10 {
      %c0_9 = arith.constant 0 : index
      %c0_10 = arith.constant 0 : index
      %11 = vector.load %arg6[%c0_9, %c0_10] : memref<1x4xf32, #tpu.memory_space<vmem>>, vector<1x4xf32>
      %cst_11 = arith.constant 3.906250e-03 : f32
      %12 = vector.broadcast %cst_11 : f32 to vector<1x4xf32>
      %13 = arith.mulf %11, %12 : vector<1x4xf32>
      %c0_12 = arith.constant 0 : index
      %c0_13 = arith.constant 0 : index
      %14 = vector.load %arg3[%c0_12, %c0_13] : memref<4x8xf32, #tpu.memory_space<vmem>>, vector<4x8xf32>
      %cst_14 = arith.constant dense<0.000000e+00> : vector<1x8xf32>
      %15 = tpu.matmul %13, %14, %cst_14 {dimension_numbers = #tpu.dot_dimension_numbers<[1], [0], [0], [1], [0, 0, 1, 1], [], []>} : vector<1x4xf32>, vector<4x8xf32>, vector<1x8xf32> -> vector<1x8xf32>
      %c0_15 = arith.constant 0 : index
      %c0_16 = arith.constant 0 : index
      %16 = vector.load %arg4[%c0_15, %c0_16] : memref<3x8xf32, #tpu.memory_space<vmem>>, vector<1x8xf32>
      %17 = arith.addf %15, %16 : vector<1x8xf32>
      %cst_17 = arith.constant 0.000000e+00 : f32
      %18 = vector.broadcast %cst_17 : f32 to vector<1x8xf32>
      %19 = arith.cmpf oge, %17, %18 : vector<1x8xf32>
      %cst_18 = arith.constant 0.00999999977 : f32
      %20 = vector.broadcast %cst_18 : f32 to vector<1x8xf32>
      %21 = arith.mulf %20, %17 : vector<1x8xf32>
      %22 = arith.select %19, %17, %21 : vector<1x8xi1>, vector<1x8xf32>
      %c1 = arith.constant 1 : index
      %c0_19 = arith.constant 0 : index
      %23 = vector.load %arg4[%c1, %c0_19] : memref<3x8xf32, #tpu.memory_space<vmem>>, vector<1x8xf32>
      %24 = arith.mulf %22, %23 : vector<1x8xf32>
      %c2 = arith.constant 2 : index
      %c0_20 = arith.constant 0 : index
      %25 = vector.load %arg4[%c2, %c0_20] : memref<3x8xf32, #tpu.memory_space<vmem>>, vector<1x8xf32>
      %26 = arith.addf %24, %25 : vector<1x8xf32>
      %27 = vector.shape_cast %26 : vector<1x8xf32> to vector<1x1x8xf32>
      %c0_21 = arith.constant 0 : index
      %c0_22 = arith.constant 0 : index
      %c0_23 = arith.constant 0 : index
      %28 = vector.load %arg5[%c0_21, %c0_22, %c0_23] : memref<1x1x8xf32, #tpu.memory_space<vmem>>, vector<1x1x8xf32>
      tpu.vector_store %arg5[%c0_21, %c0_22, %c0_23], %27 {strides = array<i32>} : memref<1x1x8xf32, #tpu.memory_space<vmem>>, vector<1x1x8xf32>,
    } else {
    }
    return
  }
  func.func @transform_0(%arg0: i32, %arg1: i32) -> (i32, i32, i32) {
    %c0_i32 = arith.constant 0 : i32
    %c0_i32_0 = arith.constant 0 : i32
    return %arg0, %c0_i32, %arg1 : i32, i32, i32
  }
  func.func @transform_1(%arg0: i32, %arg1: i32) -> (i32, i32) {
    %c0_i32 = arith.constant 0 : i32
    %c0_i32_0 = arith.constant 0 : i32
    %c0_i32_1 = arith.constant 0 : i32
    return %c0_i32, %c0_i32_0 : i32, i32
  }
  func.func @transform_2(%arg0: i32, %arg1: i32) -> (i32, i32) {
    %c0_i32 = arith.constant 0 : i32
    %c0_i32_0 = arith.constant 0 : i32
    %c0_i32_1 = arith.constant 0 : i32
    return %c0_i32, %c0_i32_0 : i32, i32
  }
  func.func @transform_3(%arg0: i32, %arg1: i32) -> (i32, i32, i32) {
    %c0_i32 = arith.constant 0 : i32
    %c0_i32_0 = arith.constant 0 : i32
    %c0_i32_1 = arith.constant 0 : i32
    return %arg0, %c0_i32, %c0_i32_0 : i32, i32, i32
  }
}

</mosaic_0001>

<bundles_post_ra>
// kernel: tpu_custom_call.1
= control target key start
LH: loop header
LB: loop body
LE: loop exit
PB: predicated region body
PF: predicated region fallthrough
CT: control target
= control target key end

     0   :  { %8 = vsyncpa [#allocation4], 0  ;;  %s1001_s0 = inlined_call_operand.hbm [shape: f32[2,4,256], index: 0, kind: input, shape index: {}]   ;;  %s1002_s1 = inlined_call_operand.hbm [shape: f32[4,8], index: 1, kind: input, shape index: {}]   ;;  %s1003_s2 = inlined_call_operand.vmem [shape: f32[3,8], index: 2, kind: input, shape index: {}]   ;;  %s1004_s3 = inlined_call_operand.hbm [shape: f32[2,1,8], index: 3, kind: output, shape index: {}]  }
   0x1   :  { %10 = vsyncpa [#allocation4 + $0x1], 0 }
   0x2   :  { %11 = vsyncpa [#allocation7], 0 }
   0x3   :  { %12 = vsyncpa [#allocation5], 0 }
   0x4   :  { %14 = vsyncpa [#allocation5 + $0x1], 0  ;;  %s770_s12 = smov 0   ;;  %s772_s13 = smov 0  }
   0x5   :  { %s774_s14 = smov 0   ;;  %s776_s15 = smov 0  }
   0x6   :  { %s778_s16 = smov 0   ;;  %s780_s17 = smov 0  }
   0x7 LB: > { %s494_s18 = sadd.s32 4294967295, %s741_s17   ;;  %s495_s19 = sadd.s32 4294967294, %s741_s17   ;;  %s741_s17 = sphi %s780_s17, %s20_s17   ;;  %s737_s16 = sphi %s778_s16, %s1029_s16   ;;  %s733_s15 = sphi %s776_s15, %s1028_s15   ;;  %s729_s14 = sphi %s774_s14, %s1027_s14   ;;  %s725_s13 = sphi %s772_s13, %s1026_s13   ;;  %s721_s12 = sphi %s770_s12, %s1025_s12  }
   0x8   : > { %p54_p0 = scmp.ne.s32.totalorder %s725_s13, %s721_s12  ;;  %p804_p1 = scmp.eq.s32.totalorder %s494_s18, 0 }
   0x9   : > { %p808_p2 = scmp.eq.s32.totalorder %s494_s18, 1  ;;  %p126_p3 = scmp.eq.s32.totalorder %s495_s19, 1 }
   0xa   : > { %s1009_s20 = scalar_select %p804_p1, 1, 0 }
   0xb   : > { %s1010_s21 = scalar_select %p808_p2, 1, 0 }
   0xc   : > { %p814_p4 = por %p804_p1, %p54_p0  ;;  %p496_p5 = scmp.ge.s32.totalorder %s741_s17, 1 }
   0xd   : > { %p819_p6 = por %p126_p3, %p54_p0  ;;  %p133_p7 = scmp.lt.s32.totalorder %s741_s17, 3 }
   0xe   : > { %s1011_s22 = scalar_select %p814_p4, 1, 0 }
   0xf   : > { %s1012_s23 = scalar_select %p819_p6, 1, 0 }
  0x10   : > { %p824_p8 = pnand %p496_p5, %p133_p7  ;;  %s743_s25 = smov [#allocation6]  }
  0x11   : > { %s146_s26 = sshll.u32 %s743_s25, 4  ;;  %s32_s28 = sadd.s32 1, %s737_s16  ;;  %s147_s26 = int_to_ptr.vmem [resolvable:$true] %s146_s26 }
  0x12   : > { %s1013_s24 = scalar_select %p824_p8, 1, 0 }
  0x13   : > { %p526_p10 = pneg %p824_p8  ;;  %s41_s29 = sadd.s32 1, %s729_s14 }
  0x14   : > { %p839_p12 = scmp.ge.s32.totalorder %s32_s28, 2  ;;  %s597_s6 = scalar_lea.hbm %s1002_s1, 64 }
  0x15   : > { %p833_p11 = pnand %p526_p10, %p804_p1  ;;  %p598_p13 = scmp.ne.s32.totalorder %s1002_s1, %s597_s6 }
  0x16   : > { %s1015_s30 = scalar_select %p839_p12, 1, 0 }
  0x17   : > { %p599_p0 = pneg %p833_p11  ;;  %p604_p7 = scmp.lt.u32.totalorder %s597_s6, %s1002_s1 }
  0x19   : > { %p600_p3 = pnand %p599_p0, %p598_p13 }
  0x1b   : > { %p601_p5 = pneg %p600_p3 }
  0x1d   : > { %p606_p10 = pnand %p604_p7, %p601_p5 }
  0x1f   : > { %609 = shalt.err (!%p606_p10)
}
  0x20   : > { %s610_s11 = scalar_lea.vmem %s147_s26, 64  ;;  %p618_p4 = scmp.lt.s32.totalorder %s147_s26, %s147_s26 }
  0x21   : > { %p611_p9 = scmp.ne.s32.totalorder %s147_s26, %s610_s11  ;;  %p619_p8 = scmp.lt.s32.totalorder %s610_s11, %s610_s11 }
  0x23   : > { %p613_p6 = pnand %p611_p9, %p599_p0  ;;  %p620_p2 = por %p619_p8, %p618_p4 }
  0x25   : > { %p614_p1 = pneg %p613_p6 }
  0x27   : > { %p621_p12 = pnand %p620_p2, %p614_p1 }
  0x29   : > { %624 = shalt.err (!%p621_p12)
}
  0x2a   : > { %529 = dma.hbm_to_vmem [thread:$0]  (!%p833_p11), %s1002_s1, 64, %s147_s26, [#allocation7]  }
  0x2b   : > { %p1016_p4 = scmp.ne.s32.totalorder %s1015_s30, 0  ;;  %p48_p1 = scmp.ne.s32.totalorder %s729_s14, %s725_s13 }
  0x2c   : > { %p49_p2 = scmp.eq.s32.totalorder %s741_s17, 0  ;;  %p539_p6 = scmp.lt.s32.totalorder %s741_s17, 2 }
  0x2d   : > { %s1031_s28 = smov (%p1016_p4, %s32_s28), 0  ;;  %p1017_p12 = scmp.ne.s32.totalorder %s1010_s21, 0 }
  0x2e   : > { %s36_s25 = ssub.s32 %s737_s16, %s1031_s28  ;;  %p50_p9 = por %p49_p2, %p48_p1 }
  0x2f   : > { %p39_p8 = scmp.eq.s32.totalorder %s36_s25, 0  ;;  %p871_p13 = por %p1017_p12, %p48_p1 }
  0x30   : > { %s160_s4 = sand.u32 1, %s729_s14   ;;  %s510_s30 = sshll.u32 %s737_s16, 7 }
  0x31   : > { %s879_s5 = scalar_select %p39_p8, %s729_s14, %s41_s29  }
  0x32   : > { %s499_s26 = sshll.u32 %s160_s4, 3  ;;  %s885_s8 = scalar_lea.hbm %s1001_s0, %s510_s30 }
  0x33   : > { %s164_s21 = scalar_lea.vmem [#allocation3], %s499_s26  ;;  %p889_p11 = pnand %p539_p6, %p50_p9 }
  0x34   : > { %s174_s9 = sshll.u32 %s164_s21, 4  ;;  %s161_s29 = scalar_lea.sflag [#allocation4], %s160_s4  ;;  %s887_s9 = int_to_ptr.vmem [resolvable:$true] %s174_s9 }
  0x35   : > { %s625_s11 = scalar_lea.hbm %s885_s8, 128  ;;  %p627_p3 = pneg %p889_p11 }
  0x36   : > { %p626_p0 = scmp.ne.s32.totalorder %s885_s8, %s625_s11  ;;  %s630_s25 = scalar_lea.hbm %s1001_s0, 256 }
  0x37   : > { %p631_p10 = scmp.lt.u32.totalorder %s885_s8, %s1001_s0  ;;  %p632_p4 = scmp.lt.u32.totalorder %s630_s25, %s625_s11 }
  0x38   : > { %p628_p5 = pnand %p627_p3, %p626_p0  ;;  %p634_p2 = scmp.lt.u32.totalorder %s625_s11, %s885_s8 }
  0x39   : > { %p633_p1 = por %p632_p4, %p631_p10 }
  0x3a   : > { %p629_p7 = pneg %p628_p5 }
  0x3b   : > { %p635_p6 = por %p634_p2, %p633_p1 }
  0x3d   : > { %p636_p8 = pnand %p635_p6, %p629_p7 }
  0x3f   : > { %639 = shalt.err (!%p636_p8)
}
  0x40   : > { %s640_s4 = scalar_lea.vmem %s887_s9, 128  ;;  %s744_s6 = smov [#allocation3]  }
  0x41   : > { %p641_p9 = scmp.ne.s32.totalorder %s887_s9, %s640_s4  ;;  %s645_s7 = sshll.u32 %s744_s6, 4  ;;  %s646_s7 = int_to_ptr.vmem [resolvable:$false] %s645_s7 }
  0x42   : > { %s647_s21 = scalar_lea.vmem %s646_s7, 256  ;;  %p648_p5 = scmp.lt.s32.totalorder %s887_s9, %s646_s7 }
  0x43   : > { %p643_p12 = pnand %p641_p9, %p627_p3  ;;  %p649_p10 = scmp.lt.s32.totalorder %s647_s21, %s640_s4 }
  0x45   : > { %p644_p0 = pneg %p643_p12  ;;  %p650_p4 = por %p649_p10, %p648_p5 }
  0x47   : > { %p651_p1 = pnand %p650_p4, %p644_p0 }
  0x49   : > { %654 = shalt.err (!%p651_p1)
}
  0x4a   : > { %533 = dma.hbm_to_vmem [thread:$0]  (!%p889_p11), %s885_s8, 128, %s887_s9, %s161_s29  }
  0x4b   : > { %p1020_p7 = scmp.ne.s32.totalorder %s1013_s24, 0 }
  0x4c   : > { %s921_s11 = sand.u32 (!%p1020_p7), 1, %s725_s13   ;;  %p1021_p3 = scmp.ne.s32.totalorder (!%p1020_p7), %s1011_s22, 0 }
  0x4d   : > { %183 = sbr.rel (%p1020_p7) target bundleno = 627 (0x273), region = 32  ;;  %s503_s18 = sshll.u32 (!%p1020_p7), %s921_s11, 3 }
  0x4e   : > { %s186_s19 = scalar_lea.sflag (!%p1020_p7), [#allocation4], %s921_s11  ;;  %s189_s25 = scalar_lea.vmem (!%p1020_p7), [#allocation3], %s503_s18 }
  0x54   : > { %708 = dma.done.wait (%p1021_p3), %s186_s19, 128  }
  0x55   : > { %710 = vsyncadd (%p1021_p3), %s186_s19, 4294967168  ;;  %p1022_p2 = scmp.ne.s32.totalorder %s1009_s20, 0 }
  0x57   : > { %712 = dma.done.wait (%p1022_p2), [#allocation7], 64  }
  0x58   : > { %714 = vsyncadd (%p1022_p2), [#allocation7], 4294967232  ;;  %vm227_vm0 = vcmask 1043456   ;;  %v222_v0 = vld [vmem:[%s189_s25] sm:$0xff]  ;;  %v745_v5 = vmov 0   ;;  %v234_v6 = vlaneseq  ;;  %vm220_vm1 = vcmask 24576  }
  0x59   : > { %v225_v1 = vcombine.high %v222_v0, %v222_v0  ;;  %v228_v2 = vsel %vm227_vm0, %v222_v0, 0.0  ;;  %595 = vset.pattern.permute.xlu0 %v745_v5  ;;  %v746_v10 = vmov 1966171168   ;;  %v747_v29 = vmov 0.0   ;;  %v306_v30 = vld [vmem:[#allocation6] sm:$0xf] }
  0x5a   : > { %v235_v7 = vshrl.u32 %v234_v6, 7  ;;  %v278_v8 = vand.u32 127, %v234_v6  ;;  %v253_v11 = vunpack.c.l.s4 %v746_v10  ;;  %221 = vst.msk [vmem:[#allocation2] sm:$0x1] %vm220_vm1, %v747_v29  ;;  %513 = vmatprep.subr.mxu0 %v747_v29  ;;  %vm748_vm2 = vmmov 0   ;;  %s507_s29 = sshll.u32 %s733_s15, 4 }
  0x5b   : > { %v229_v3 = vsel %vm227_vm0, %v225_v1, 0.0  ;;  %514 = vmatpush3.msk.msra.mxu0 %vm227_vm0, %v306_v30  ;;  %515 = vmatprep.mubr.msk.f32.mxu0 %vm748_vm2, %v747_v29  ;;  %vm308_vm3 = vcmask 31744   ;;  %v307_v39 = vld [vmem:[%s1003_s2] sm:$0x1]  ;;  %v388_v44 = vld [vmem:[%s1003_s2 + $0x1] sm:$0x1]  ;;  %s952_s7 = scalar_lea.hbm %s1004_s3, %s507_s29 }
  0x5c   : > { %v230_v4 = vadd.f32 %v229_v3, %v228_v2  ;;  %v281_v9 = vsub.s32 %v278_v8, %v235_v7  ;;  %v254_v12 = vunpack.c.0.s8 %v253_v11  ;;  %v236_v13 = vsub.s32 0, %v235_v7  ;;  %v390_v46 = vld [vmem:[%s1003_s2 + $0x2] sm:$0x1]  ;;  %s214_s26 = scalar_lea.vmem [#allocation8], %s921_s11  ;;  %s395_s21 = scalar_lea.sflag [#allocation5], %s921_s11 }
  0x5d   : > { %v240_v14 = vsub.s32 1, %v235_v7  ;;  %v244_v15 = vsub.s32 2, %v235_v7  ;;  %v248_v16 = vsub.s32 3, %v235_v7  ;;  %s407_s30 = sshll.u32 %s214_s26, 4  ;;  %vm392_vm5 = vcmask 57344   ;;  %s749_s15 = smov [#allocation8]   ;;  %s954_s30 = int_to_ptr.vmem [resolvable:$true] %s407_s30 }
  0x5e   : > { %231 = vadd.xlane.f32.xlu0 %v230_v4  ;;  %v257_v18 = vsub.s32 %v254_v12, %v235_v7  ;;  %s655_s18 = scalar_lea.vmem %s954_s30, 16  ;;  %s659_s19 = sshll.u32 %s749_s15, 4  ;;  %s660_s19 = int_to_ptr.vmem [resolvable:$false] %s659_s19 }
  0x5f   : > { %p656_p11 = scmp.ne.s32.totalorder %s954_s30, %s655_s18  ;;  %s661_s25 = scalar_lea.vmem %s660_s19, 32 }
  0x60   : > { %p662_p9 = scmp.lt.s32.totalorder %s954_s30, %s660_s19  ;;  %p663_p12 = scmp.lt.s32.totalorder %s661_s25, %s655_s18 }
  0x61   : > { %v223_v34 = vld [vmem:[#allocation2] sm:$0x1]  ;;  %p657_p6 = pnand %p656_p11, %p871_p13 }
  0x62   : > { %p664_p0 = por %p663_p12, %p662_p9 }
  0x63   : > { %p658_p8 = pneg %p657_p6 }
  0x65   : > { %p665_p5 = pnand %p664_p0, %p658_p8 }
  0xeb   : > { %v232_v17 = vpop.xlane.xlu0 %231 }
  0xec   : > { %v237_v19 = vrot.slane %v232_v17, %v236_v13  ;;  %v241_v20 = vrot.slane %v232_v17, %v240_v14  ;;  %v245_v21 = vrot.slane %v232_v17, %v244_v15  ;;  %v249_v22 = vrot.slane %v232_v17, %v248_v16 }
  0xee   : > { %v250_v23 = vcombine.low %v237_v19, %v241_v20  ;;  %v251_v24 = vcombine.low %v245_v21, %v249_v22 }
  0xf0   : > { %v258_v25 = vrot.slane %v250_v23, %v257_v18  ;;  %v265_v26 = vrot.slane %v251_v24, %v257_v18 }
  0xf2   : > { %v266_v27 = vcombine.low %v258_v25, %v265_v26 }
  0xf4   : > { %v273_v28 = vrot.slane %v266_v27, %v257_v18 }
  0xf6   : > { %275 = vperm.xlu0 %595, %v273_v28  }
 0x175   : > { %v276_v31 = vpop.permute.xlu0 %275 }
 0x176   : > { %v282_v32 = vrot.slane %v276_v31, %v281_v9 }
 0x178   : > { %v289_v33 = vrot.slane %v282_v32, %v257_v18 }
 0x17a   : > { %v296_v35 = vrot.slane %v289_v33, %v257_v18 }
 0x17c   : > { %v298_v36 = vadd.f32 %v296_v35, %v223_v34 }
 0x17e   : > { %300 = vst.msk [vmem:[#allocation2] sm:$0x1] %vm220_vm1, %v298_v36 }
 0x185   : > { %v304_v37 = vld [vmem:[#allocation2] sm:$0x1] }
 0x186   : > { %v305_v38 = vmul.f32 0.00390625, %v304_v37 }
 0x188   : > { %516 = vmatmul.mubr.msk.f32.vlgmr.msra.gmra.mrb[0].mxu0 %vm308_vm3, %v305_v38 }
 0x25b   : > { %v381_v40 = vpop.f32.mrb[0].mxu0 }
 0x25c   : > { %v382_v41 = vadd.f32 %v381_v40, %v307_v39  ;;  %v517_v42 = vpop.f32.mrb[1].mxu0 }
 0x25e   : > { %vm385_vm4 = vcmp.ge.f32.partialorder %v382_v41, 0.0  ;;  %v386_v43 = vmul.f32 0.01, %v382_v41 }
 0x260   : > { %v387_v45 = vsel %vm385_vm4, %v382_v41, %v386_v43 }
 0x261   : > { %v389_v47 = vmul.f32 %v388_v44, %v387_v45 }
 0x263   : > { %v391_v48 = vadd.f32 %v390_v46, %v389_v47 }
 0x265   : > { %393 = vst.msk [vmem:[%s214_s26] sm:$0x1] %vm392_vm5, %v391_v48 }
 0x266   : > { %668 = shalt.err (!%p665_p5)
}
 0x267   : > { %s669_s11 = scalar_lea.hbm %s952_s7, 16  ;;  %s673_s24 = scalar_lea.hbm %s1004_s3, 32 }
 0x268   : > { %p670_p10 = scmp.ne.s32.totalorder %s952_s7, %s669_s11  ;;  %p674_p7 = scmp.lt.u32.totalorder %s952_s7, %s1004_s3 }
 0x269   : > { %p675_p3 = scmp.lt.u32.totalorder %s673_s24, %s669_s11  ;;  %p677_p11 = scmp.lt.u32.totalorder %s669_s11, %s952_s7 }
 0x26a   : > { %p671_p4 = pnand %p670_p10, %p871_p13 }
 0x26b   : > { %p676_p2 = por %p675_p3, %p674_p7 }
 0x26c   : > { %p672_p1 = pneg %p671_p4 }
 0x26d   : > { %p678_p6 = por %p677_p11, %p676_p2 }
 0x26f   : > { %p679_p8 = pnand %p678_p6, %p672_p1 }
 0x271   : > { %682 = shalt.err (!%p679_p8)
}
 0x272   : > { %524 = dma.vmem_to_hbm [thread:$0]  (%p871_p13), %s954_s30, 16, %s952_s7, %s395_s21  }
 0x273 PF: > { %s419_s10 = sand.u32 1, %s721_s12   ;;  %p1023_p9 = scmp.ne.s32.totalorder %s1012_s23, 0 }
 0x274   : > { %p1024_p12 = scmp.ge.s32.totalorder %s741_s17, 2  ;;  %s420_s29 = scalar_lea.sflag [#allocation5], %s419_s10 }
 0x276   : > { %p535_p0 = pnand %p1024_p12, %p1023_p9 }
 0x278   : > { %716 = dma.done.wait (!%p535_p0), %s420_s29, 16  }
 0x279   : > { %718 = vsyncadd (!%p535_p0), %s420_s29, 4294967280  ;;  %s20_s17 = sadd.s32 1, %s741_s17   ;;  %s1025_s12 = smov %s725_s13 }
 0x27a   : > { %p17_p5 = scmp.ge.s32.totalorder %s20_s17, 4   ;;  %s1026_s13 = smov %s729_s14 }
 0x27b   : > { %s1027_s14 = smov %s879_s5  ;;  %s1028_s15 = smov %s737_s16 }
 0x27c   : > { %s1029_s16 = smov %s1031_s28  ;;  %19 = sbr.rel (!%p17_p5) target bundleno = 7 (0x7), region = 89 }
 0x283   :  { %424 = vsyncpa [#allocation4], 1 }
 0x284   :  { %426 = vsyncpa [#allocation4 + $0x1], 1 }
 0x285   :  { %427 = vsyncpa [#allocation7], 1 }
 0x286   :  { %428 = vsyncpa [#allocation5], 1 }
 0x287   :  { %430 = vsyncpa [#allocation5 + $0x1], 1 }

</bundles_post_ra>
